<compile_context>
chip_gen: v7x
topology: tpu7x:2x2x1
jax: 0.10.0
libtpu: 0.0.40
codegen_flags: <defaults>
</compile_context>

<pallas_src>
import functools

import jax
import jax.numpy as jnp
from jax import lax
from jax.experimental import pallas as pl
from jax.experimental.pallas import tpu as pltpu


def _pick_row_tiles(h_out):
    """Return (rows per grid step `ch`, rows per in-kernel tile `th`); th | ch | h_out."""
    ch = h_out
    for d in range(min(128, h_out), 7, -1):   # largest divisor of Hout, <=128, mult of 8
        if h_out % d == 0 and d % 8 == 0:
            ch = d
            break
    th = ch
    for d in (32, 24, 16, 8):                 # largest sublane-aligned divisor of ch
        if d <= ch and ch % d == 0:
            th = d
            break
    return ch, th


def _sepconv_kernel(x_hbm, wdw_ref, pwb_ref, o_ref, xbuf, sem, *,
                    kh_size, kw_size, stride, dilation, c_in,
                    w_out, w_full, hp, ch, th, nh, th_in, nbuf):
    """One grid step = (batch b, chunk j of `ch` output rows).

    x_hbm  : (N*Hp, Wp*Cin)        padded input, left in HBM (pl.ANY)
    wdw_ref: (KH*KW, Wfull*Cin)    depthwise tap weights, tiled across W
    pwb_ref: (Wout*Cin, Wout*Cout) block-diagonal pointwise matrix
    o_ref  : (1, ch, Wout*Cout)    output block (lane-dense last dim)
    xbuf   : (nbuf, th_in, Wp*Cin) VMEM (double-)buffer for input row slabs
    sem    : (nbuf,)               DMA semaphores
    """
    b = pl.program_id(0)
    j = pl.program_id(1)
    wfull_c = w_full * c_in
    wout_c = w_out * c_in
    n_taps = kh_size * kw_size

    # Hoist the (tiny) weights and their sublane broadcasts once per grid step;
    # avoids per-tile reloads / per-iteration broadcast_in_dim inside the loop.
    w_taps = wdw_ref[...].astype(jnp.float32)                      # (KH*KW, Wfull*Cin)
    tap_b = [jnp.broadcast_to(w_taps[t:t + 1, :], (th, wfull_c)) for t in range(n_taps)]
    pw_blk = pwb_ref[...].astype(jnp.float32)                      # (Wout*Cin, Wout*Cout)

    def tile_copy(row0, slot):
        r0 = b * hp + (j * ch + row0) * stride
        return pltpu.make_async_copy(
            x_hbm.at[pl.ds(r0, th_in), :], xbuf.at[slot], sem.at[slot])

    def compute_tile(slot):
        # ---- depthwise conv: KH*KW lane-dense FMAs on ref-sliced windows ----
        acc = jnp.zeros((th, wfull_c), jnp.float32)
        for ki in range(kh_size):
            if stride == 1:
                row_sl = pl.ds(ki * dilation, th)
            else:
                row_sl = pl.ds(ki * dilation, th, stride)          # H-stride on sublanes only
            for kj in range(kw_size):
                patch = xbuf[slot, row_sl, pl.ds(kj * dilation * c_in, wfull_c)]
                acc = acc + patch.astype(jnp.float32) * tap_b[ki * kw_size + kj]
        if stride > 1:
            # Subsample W on the lane axis via reshape + take (no strided lane loads).
            acc = jnp.pad(acc, ((0, 0), (0, w_out * stride * c_in - wfull_c)))
            acc = acc.reshape(th, w_out, stride, c_in)[:, :, 0, :].reshape(th, wout_c)
        # ---- pointwise 1x1 conv: a single lane-dense MXU matmul ----
        return jnp.dot(acc, pw_blk, preferred_element_type=jnp.float32)

    tile_copy(0, 0).start()                                        # prime slot 0

    if nh == 1:
        # Single tile per chunk: static full-block store, no loop machinery.
        tile_copy(0, 0).wait()
        o_ref[0, :, :] = compute_tile(0).astype(o_ref.dtype)
    else:
        @pl.loop(0, nh)
        def _(hidx):
            slot = hidx & 1
            row0 = pl.multiple_of(hidx * th, th)
            tile_copy(row0, slot).wait()

            @pl.when(hidx + 1 < nh)
            def _():
                nxt = pl.multiple_of((hidx + 1) * th, th)
                tile_copy(nxt, 1 - slot).start()                   # prefetch next slab

            o_ref[0, pl.ds(row0, th), :] = compute_tile(slot).astype(o_ref.dtype)


def separable_conv2d(x_nchw, dw_weight, pw_weight, *,
                     stride=1, padding=0, dilation=1):
    """x_nchw: (N, Cin, H, W); dw_weight: (Cin, 1, KH, KW);
    pw_weight: (Cout, Cin, 1, 1). Returns (N, Cout, Hout, Wout)."""
    n, c_in, h, w = x_nchw.shape
    kh_size, kw_size = dw_weight.shape[2], dw_weight.shape[3]
    c_out = pw_weight.shape[0]
    h_out = (h + 2 * padding - dilation * (kh_size - 1) - 1) // stride + 1
    w_out = (w + 2 * padding - dilation * (kw_size - 1) - 1) // stride + 1
    assert h_out > 0 and w_out > 0

    # Glue: NCHW -> channels-last, zero-padded, W folded into the lane axis.
    x = jnp.transpose(x_nchw, (0, 2, 3, 1))                         # (N, H, W, Cin)
    x = jnp.pad(x, ((0, 0), (padding, padding), (padding, padding), (0, 0)))
    hp, wp = x.shape[1], x.shape[2]
    x2d = x.reshape(n * hp, wp * c_in)                              # (N*Hp, Wp*Cin)

    w_full = (w_out - 1) * stride + 1
    # Depthwise taps tiled across the W window -> one lane-wide FMA per tap.
    dw = jnp.transpose(dw_weight[:, 0], (1, 2, 0)).reshape(kh_size * kw_size, c_in)
    wdw_tiled = jnp.tile(dw[:, None, :].astype(jnp.float32),
                         (1, w_full, 1)).reshape(kh_size * kw_size, w_full * c_in)

    # Pointwise conv as a block-diagonal matmul (lane-dense shapes for tiny Cin/Cout).
    pw_mat = jnp.transpose(pw_weight[:, :, 0, 0], (1, 0)).astype(jnp.float32)  # (Cin, Cout)
    pw_blk = jnp.kron(jnp.eye(w_out, dtype=jnp.float32), pw_mat)    # (Wout*Cin, Wout*Cout)

    ch, th = _pick_row_tiles(h_out)
    nc = h_out // ch                      # row chunks per image (grid axis)
    nh = ch // th                         # row tiles per chunk (in-kernel pipeline)
    th_in = (th - 1) * stride + 1 + (kh_size - 1) * dilation
    nbuf = 1 if nh == 1 else 2

    kernel = functools.partial(
        _sepconv_kernel,
        kh_size=kh_size, kw_size=kw_size, stride=stride, dilation=dilation,
        c_in=c_in, w_out=w_out, w_full=w_full, hp=hp, ch=ch, th=th, nh=nh,
        th_in=th_in, nbuf=nbuf)

    flops = 2 * n * h_out * w_out * c_in * (kh_size * kw_size + c_out)
    bytes_accessed = (x2d.size * x2d.dtype.itemsize
                      + wdw_tiled.size * 4 + pw_blk.size * 4
                      + n * h_out * w_out * c_out * x_nchw.dtype.itemsize)

    out2d = pl.pallas_call(
        kernel,
        out_shape=jax.ShapeDtypeStruct((n, h_out, w_out * c_out), x_nchw.dtype),
        grid_spec=pltpu.PrefetchScalarGridSpec(
            num_scalar_prefetch=0,
            grid=(n, nc),
            in_specs=[
                pl.BlockSpec(memory_space=pl.ANY),                  # input stays in HBM
                pl.BlockSpec((kh_size * kw_size, w_full * c_in), lambda b, j: (0, 0)),
                pl.BlockSpec((w_out * c_in, w_out * c_out), lambda b, j: (0, 0)),
            ],
            out_specs=pl.BlockSpec((1, ch, w_out * c_out), lambda b, j: (b, j, 0)),
            scratch_shapes=[
                pltpu.VMEM((nbuf, th_in, wp * c_in), x2d.dtype),    # input (double) buffer
                pltpu.SemaphoreType.DMA((nbuf,)),
            ]),
        compiler_params=pltpu.CompilerParams(
            dimension_semantics=("parallel", "parallel"),
            vmem_limit_bytes=32 * 1024 * 1024),
        cost_estimate=pl.CostEstimate(flops=flops, transcendentals=0,
                                      bytes_accessed=bytes_accessed),
    )(x2d, wdw_tiled, pw_blk)

    out = out2d.reshape(n, h_out, w_out, c_out)
    return jnp.transpose(out, (0, 3, 1, 2))                         # back to NCHW


def _reference(x_nchw, dw_weight, pw_weight, *, stride, padding, dilation):
    c_in = x_nchw.shape[1]
    y = lax.conv_general_dilated(
        x_nchw, dw_weight,
        window_strides=(stride, stride),
        padding=[(padding, padding), (padding, padding)],
        rhs_dilation=(dilation, dilation),
        dimension_numbers=("NCHW", "OIHW", "NCHW"),
        feature_group_count=c_in)
    z = lax.conv_general_dilated(
        y, pw_weight,
        window_strides=(1, 1), padding=[(0, 0), (0, 0)],
        dimension_numbers=("NCHW", "OIHW", "NCHW"))
    return z


if __name__ == "__main__":
    # SeparableConv2d(in_channels=4, out_channels=8, kernel_size=3, padding=1)
    N, C_IN, C_OUT, H, W = 2, 4, 8, 16, 16
    K, STRIDE, PAD, DIL = 3, 1, 1, 1

    key = jax.random.PRNGKey(0)
    kx, kd, kp = jax.random.split(key, 3)
    x = jax.random.normal(kx, (N, C_IN, H, W), jnp.float32)
    # PyTorch parameter shapes: conv1.weight (Cin,1,K,K), pointwise.weight (Cout,Cin,1,1)
    dw_weight = jax.random.normal(kd, (C_IN, 1, K, K), jnp.float32) * 0.1
    pw_weight = jax.random.normal(kp, (C_OUT, C_IN, 1, 1), jnp.float32) * 0.1

    out = separable_conv2d(x, dw_weight, pw_weight,
                           stride=STRIDE, padding=PAD, dilation=DIL)
    out = jax.block_until_ready(out)

    ref = _reference(x, dw_weight, pw_weight,
                     stride=STRIDE, padding=PAD, dilation=DIL)
    assert out.shape == (N, C_OUT, H, W), out.shape
    err = float(jnp.max(jnp.abs(out - ref)))
    assert jnp.allclose(out, ref, atol=5e-5, rtol=5e-5), err

    print("KERNEL_OK")
</pallas_src>

<mosaic_0001>
module attributes {stable_mosaic.version = 11 : i64} {
  func.func @_sepconv_kernel(%arg0: i32, %arg1: i32, %arg2: memref<36x72xf32, #tpu.memory_space<any>>, %arg3: memref<9x64xf32, #tpu.memory_space<vmem>>, %arg4: memref<64x128xf32, #tpu.memory_space<vmem>>, %arg5: memref<1x16x128xf32, #tpu.memory_space<vmem>>, %arg6: memref<1x18x72xf32, #tpu.memory_space<vmem>>, %arg7: memref<1x!tpu.dma_semaphore, #tpu.memory_space<semaphore_mem>>) attributes {dimension_semantics = [#tpu.dimension_semantics<parallel>, #tpu.dimension_semantics<parallel>], iteration_bounds = array<i64: 2, 1>, scalar_prefetch = 0 : i64, scratch_operands = 2 : i64, tpu.core_type = #tpu.core_type<tc>, window_params = [{}, {pipeline_mode = #tpu.pipeline_mode<synchronous>, transform_indices = @transform_1, window_bounds = array<i64: 9, 64>}, {pipeline_mode = #tpu.pipeline_mode<synchronous>, transform_indices = @transform_2, window_bounds = array<i64: 64, 128>}, {transform_indices = @transform_3, window_bounds = array<i64: 1, 16, 128>}]} {
    %c0 = arith.constant 0 : index
    %c0_0 = arith.constant 0 : index
    %0 = vector.load %arg3[%c0, %c0_0] : memref<9x64xf32, #tpu.memory_space<vmem>>, vector<9x64xf32>
    %1 = vector.extract_strided_slice %0 {offsets = [0, 0], sizes = [1, 64], strides = [1, 1]} : vector<9x64xf32> to vector<1x64xf32>
    %2 = vector.shape_cast %1 : vector<1x64xf32> to vector<1x64xf32>
    %3 = vector.broadcast %2 : vector<1x64xf32> to vector<16x64xf32>
    %4 = vector.extract_strided_slice %0 {offsets = [1, 0], sizes = [1, 64], strides = [1, 1]} : vector<9x64xf32> to vector<1x64xf32>
    %5 = vector.shape_cast %4 : vector<1x64xf32> to vector<1x64xf32>
    %6 = vector.broadcast %5 : vector<1x64xf32> to vector<16x64xf32>
    %7 = vector.extract_strided_slice %0 {offsets = [2, 0], sizes = [1, 64], strides = [1, 1]} : vector<9x64xf32> to vector<1x64xf32>
    %8 = vector.shape_cast %7 : vector<1x64xf32> to vector<1x64xf32>
    %9 = vector.broadcast %8 : vector<1x64xf32> to vector<16x64xf32>
    %10 = vector.extract_strided_slice %0 {offsets = [3, 0], sizes = [1, 64], strides = [1, 1]} : vector<9x64xf32> to vector<1x64xf32>
    %11 = vector.shape_cast %10 : vector<1x64xf32> to vector<1x64xf32>
    %12 = vector.broadcast %11 : vector<1x64xf32> to vector<16x64xf32>
    %13 = vector.extract_strided_slice %0 {offsets = [4, 0], sizes = [1, 64], strides = [1, 1]} : vector<9x64xf32> to vector<1x64xf32>
    %14 = vector.shape_cast %13 : vector<1x64xf32> to vector<1x64xf32>
    %15 = vector.broadcast %14 : vector<1x64xf32> to vector<16x64xf32>
    %16 = vector.extract_strided_slice %0 {offsets = [5, 0], sizes = [1, 64], strides = [1, 1]} : vector<9x64xf32> to vector<1x64xf32>
    %17 = vector.shape_cast %16 : vector<1x64xf32> to vector<1x64xf32>
    %18 = vector.broadcast %17 : vector<1x64xf32> to vector<16x64xf32>
    %19 = vector.extract_strided_slice %0 {offsets = [6, 0], sizes = [1, 64], strides = [1, 1]} : vector<9x64xf32> to vector<1x64xf32>
    %20 = vector.shape_cast %19 : vector<1x64xf32> to vector<1x64xf32>
    %21 = vector.broadcast %20 : vector<1x64xf32> to vector<16x64xf32>
    %22 = vector.extract_strided_slice %0 {offsets = [7, 0], sizes = [1, 64], strides = [1, 1]} : vector<9x64xf32> to vector<1x64xf32>
    %23 = vector.shape_cast %22 : vector<1x64xf32> to vector<1x64xf32>
    %24 = vector.broadcast %23 : vector<1x64xf32> to vector<16x64xf32>
    %25 = vector.extract_strided_slice %0 {offsets = [8, 0], sizes = [1, 64], strides = [1, 1]} : vector<9x64xf32> to vector<1x64xf32>
    %26 = vector.shape_cast %25 : vector<1x64xf32> to vector<1x64xf32>
    %27 = vector.broadcast %26 : vector<1x64xf32> to vector<16x64xf32>
    %c0_1 = arith.constant 0 : index
    %c0_2 = arith.constant 0 : index
    %28 = vector.load %arg4[%c0_1, %c0_2] : memref<64x128xf32, #tpu.memory_space<vmem>>, vector<64x128xf32>
    %c18_i32 = arith.constant 18 : i32
    %29 = arith.muli %arg0, %c18_i32 : i32
    %c16_i32 = arith.constant 16 : i32
    %30 = arith.muli %arg1, %c16_i32 : i32
    %c0_i32 = arith.constant 0 : i32
    %31 = arith.addi %30, %c0_i32 : i32
    %c1_i32 = arith.constant 1 : i32
    %32 = arith.muli %31, %c1_i32 : i32
    %33 = arith.addi %29, %32 : i32
    %c0_i32_3 = arith.constant 0 : i32
    %c0_i32_4 = arith.constant 0 : i32
    %c0_i32_5 = arith.constant 0 : i32
    %34 = tpu.memref_slice %arg2[%33, %c0_i32_5] : memref<36x72xf32, #tpu.memory_space<any>> -> memref<18x72xf32, #tpu.memory_space<any>>
    %c0_i32_6 = arith.constant 0 : i32
    %c0_i32_7 = arith.constant 0 : i32
    %35 = tpu.memref_slice %arg6[%c0_i32_3, %c0_i32_6, %c0_i32_7] : memref<1x18x72xf32, #tpu.memory_space<vmem>> -> memref<1x18x72xf32, #tpu.memory_space<vmem>>
    %36 = tpu.memref_squeeze %35 : memref<1x18x72xf32, #tpu.memory_space<vmem>> -> memref<18x72xf32, #tpu.memory_space<vmem>>
    %37 = tpu.memref_slice %arg7[%c0_i32_4] : memref<1x!tpu.dma_semaphore, #tpu.memory_space<semaphore_mem>> -> memref<1x!tpu.dma_semaphore, #tpu.memory_space<semaphore_mem>>
    %38 = tpu.memref_squeeze %37 : memref<1x!tpu.dma_semaphore, #tpu.memory_space<semaphore_mem>> -> memref<!tpu.dma_semaphore, #tpu.memory_space<semaphore_mem>>
    tpu.enqueue_dma source(%34 : memref<18x72xf32, #tpu.memory_space<any>>) target(%36 : memref<18x72xf32, #tpu.memory_space<vmem>>) target_semaphore(%38 : memref<!tpu.dma_semaphore, #tpu.memory_space<semaphore_mem>>)
    %c18_i32_8 = arith.constant 18 : i32
    %39 = arith.muli %arg0, %c18_i32_8 : i32
    %c16_i32_9 = arith.constant 16 : i32
    %40 = arith.muli %arg1, %c16_i32_9 : i32
    %c0_i32_10 = arith.constant 0 : i32
    %41 = arith.addi %40, %c0_i32_10 : i32
    %c1_i32_11 = arith.constant 1 : i32
    %42 = arith.muli %41, %c1_i32_11 : i32
    %43 = arith.addi %39, %42 : i32
    %c0_i32_12 = arith.constant 0 : i32
    %c0_i32_13 = arith.constant 0 : i32
    %c0_i32_14 = arith.constant 0 : i32
    %44 = tpu.memref_slice %arg2[%43, %c0_i32_14] : memref<36x72xf32, #tpu.memory_space<any>> -> memref<18x72xf32, #tpu.memory_space<any>>
    %c0_i32_15 = arith.constant 0 : i32
    %c0_i32_16 = arith.constant 0 : i32
    %45 = tpu.memref_slice %arg6[%c0_i32_12, %c0_i32_15, %c0_i32_16] : memref<1x18x72xf32, #tpu.memory_space<vmem>> -> memref<1x18x72xf32, #tpu.memory_space<vmem>>
    %46 = tpu.memref_squeeze %45 : memref<1x18x72xf32, #tpu.memory_space<vmem>> -> memref<18x72xf32, #tpu.memory_space<vmem>>
    %47 = tpu.memref_slice %arg7[%c0_i32_13] : memref<1x!tpu.dma_semaphore, #tpu.memory_space<semaphore_mem>> -> memref<1x!tpu.dma_semaphore, #tpu.memory_space<semaphore_mem>>
    %48 = tpu.memref_squeeze %47 : memref<1x!tpu.dma_semaphore, #tpu.memory_space<semaphore_mem>> -> memref<!tpu.dma_semaphore, #tpu.memory_space<semaphore_mem>>
    tpu.wait_dma2 semaphore(%48 : memref<!tpu.dma_semaphore, #tpu.memory_space<semaphore_mem>>) src(%44 : memref<18x72xf32, #tpu.memory_space<any>>) dst(%46 : memref<18x72xf32, #tpu.memory_space<vmem>>)
    %cst = arith.constant 0.000000e+00 : f32
    %49 = vector.broadcast %cst : f32 to vector<16x64xf32>
    %c0_17 = arith.constant 0 : index
    %c0_18 = arith.constant 0 : index
    %c0_19 = arith.constant 0 : index
    %50 = vector.load %arg6[%c0_17, %c0_18, %c0_19] : memref<1x18x72xf32, #tpu.memory_space<vmem>>, vector<1x16x64xf32>
    %51 = vector.shape_cast %50 : vector<1x16x64xf32> to vector<16x64xf32>
    %52 = arith.mulf %51, %3 : vector<16x64xf32>
    %53 = arith.addf %49, %52 : vector<16x64xf32>
    %c0_20 = arith.constant 0 : index
    %c0_21 = arith.constant 0 : index
    %c4 = arith.constant 4 : index
    %54 = vector.load %arg6[%c0_20, %c0_21, %c4] : memref<1x18x72xf32, #tpu.memory_space<vmem>>, vector<1x16x64xf32>
    %55 = vector.shape_cast %54 : vector<1x16x64xf32> to vector<16x64xf32>
    %56 = arith.mulf %55, %6 : vector<16x64xf32>
    %57 = arith.addf %53, %56 : vector<16x64xf32>
    %c0_22 = arith.constant 0 : index
    %c0_23 = arith.constant 0 : index
    %c8 = arith.constant 8 : index
    %58 = vector.load %arg6[%c0_22, %c0_23, %c8] : memref<1x18x72xf32, #tpu.memory_space<vmem>>, vector<1x16x64xf32>
    %59 = vector.shape_cast %58 : vector<1x16x64xf32> to vector<16x64xf32>
    %60 = arith.mulf %59, %9 : vector<16x64xf32>
    %61 = arith.addf %57, %60 : vector<16x64xf32>
    %c0_24 = arith.constant 0 : index
    %c1 = arith.constant 1 : index
    %c0_25 = arith.constant 0 : index
    %62 = vector.load %arg6[%c0_24, %c1, %c0_25] : memref<1x18x72xf32, #tpu.memory_space<vmem>>, vector<1x16x64xf32>
    %63 = vector.shape_cast %62 : vector<1x16x64xf32> to vector<16x64xf32>
    %64 = arith.mulf %63, %12 : vector<16x64xf32>
    %65 = arith.addf %61, %64 : vector<16x64xf32>
    %c0_26 = arith.constant 0 : index
    %c1_27 = arith.constant 1 : index
    %c4_28 = arith.constant 4 : index
    %66 = vector.load %arg6[%c0_26, %c1_27, %c4_28] : memref<1x18x72xf32, #tpu.memory_space<vmem>>, vector<1x16x64xf32>
    %67 = vector.shape_cast %66 : vector<1x16x64xf32> to vector<16x64xf32>
    %68 = arith.mulf %67, %15 : vector<16x64xf32>
    %69 = arith.addf %65, %68 : vector<16x64xf32>
    %c0_29 = arith.constant 0 : index
    %c1_30 = arith.constant 1 : index
    %c8_31 = arith.constant 8 : index
    %70 = vector.load %arg6[%c0_29, %c1_30, %c8_31] : memref<1x18x72xf32, #tpu.memory_space<vmem>>, vector<1x16x64xf32>
    %71 = vector.shape_cast %70 : vector<1x16x64xf32> to vector<16x64xf32>
    %72 = arith.mulf %71, %18 : vector<16x64xf32>
    %73 = arith.addf %69, %72 : vector<16x64xf32>
    %c0_32 = arith.constant 0 : index
    %c2 = arith.constant 2 : index
    %c0_33 = arith.constant 0 : index
    %74 = vector.load %arg6[%c0_32, %c2, %c0_33] : memref<1x18x72xf32, #tpu.memory_space<vmem>>, vector<1x16x64xf32>
    %75 = vector.shape_cast %74 : vector<1x16x64xf32> to vector<16x64xf32>
    %76 = arith.mulf %75, %21 : vector<16x64xf32>
    %77 = arith.addf %73, %76 : vector<16x64xf32>
    %c0_34 = arith.constant 0 : index
    %c2_35 = arith.constant 2 : index
    %c4_36 = arith.constant 4 : index
    %78 = vector.load %arg6[%c0_34, %c2_35, %c4_36] : memref<1x18x72xf32, #tpu.memory_space<vmem>>, vector<1x16x64xf32>
    %79 = vector.shape_cast %78 : vector<1x16x64xf32> to vector<16x64xf32>
    %80 = arith.mulf %79, %24 : vector<16x64xf32>
    %81 = arith.addf %77, %80 : vector<16x64xf32>
    %c0_37 = arith.constant 0 : index
    %c2_38 = arith.constant 2 : index
    %c8_39 = arith.constant 8 : index
    %82 = vector.load %arg6[%c0_37, %c2_38, %c8_39] : memref<1x18x72xf32, #tpu.memory_space<vmem>>, vector<1x16x64xf32>
    %83 = vector.shape_cast %82 : vector<1x16x64xf32> to vector<16x64xf32>
    %84 = arith.mulf %83, %27 : vector<16x64xf32>
    %85 = arith.addf %81, %84 : vector<16x64xf32>
    %cst_40 = arith.constant dense<0.000000e+00> : vector<16x128xf32>
    %86 = tpu.matmul %85, %28, %cst_40 {dimension_numbers = #tpu.dot_dimension_numbers<[1], [0], [0], [1], [0, 0, 1, 1], [], []>} : vector<16x64xf32>, vector<64x128xf32>, vector<16x128xf32> -> vector<16x128xf32>
    %c0_41 = arith.constant 0 : index
    %c0_42 = arith.constant 0 : index
    %c0_43 = arith.constant 0 : index
    %87 = vector.load %arg5[%c0_41, %c0_42, %c0_43] : memref<1x16x128xf32, #tpu.memory_space<vmem>>, vector<1x16x128xf32>
    %88 = vector.shape_cast %87 : vector<1x16x128xf32> to vector<16x128xf32>
    %89 = vector.shape_cast %86 : vector<16x128xf32> to vector<1x16x128xf32>
    tpu.vector_store %arg5[%c0_41, %c0_42, %c0_43], %89 {strides = array<i32>} : memref<1x16x128xf32, #tpu.memory_space<vmem>>, vector<1x16x128xf32>,
    return
  }
  func.func @transform_1(%arg0: i32, %arg1: i32) -> (i32, i32) {
    %c0_i32 = arith.constant 0 : i32
    %c0_i32_0 = arith.constant 0 : i32
    %c0_i32_1 = arith.constant 0 : i32
    return %c0_i32, %c0_i32_0 : i32, i32
  }
  func.func @transform_2(%arg0: i32, %arg1: i32) -> (i32, i32) {
    %c0_i32 = arith.constant 0 : i32
    %c0_i32_0 = arith.constant 0 : i32
    %c0_i32_1 = arith.constant 0 : i32
    return %c0_i32, %c0_i32_0 : i32, i32
  }
  func.func @transform_3(%arg0: i32, %arg1: i32) -> (i32, i32, i32) {
    %c0_i32 = arith.constant 0 : i32
    %c0_i32_0 = arith.constant 0 : i32
    return %arg0, %arg1, %c0_i32 : i32, i32, i32
  }
}

</mosaic_0001>

<bundles_post_ra>
// kernel: tpu_custom_call.1
= control target key start
LH: loop header
LB: loop body
LE: loop exit
PB: predicated region body
PF: predicated region fallthrough
CT: control target
= control target key end

     0   :  { %8 = vsyncpa [#allocation5], 0  ;;  %s1128_s0 = inlined_call_operand.hbm [shape: f32[36,72], index: 0, kind: input, shape index: {}]   ;;  %s1129_s1 = inlined_call_operand.hbm [shape: f32[9,64], index: 1, kind: input, shape index: {}]   ;;  %s1130_s2 = inlined_call_operand.hbm [shape: f32[64,128], index: 2, kind: input, shape index: {}]   ;;  %s1131_s3 = inlined_call_operand.hbm [shape: f32[2,16,128], index: 3, kind: output, shape index: {}]  }
   0x1   :  { %9 = vsyncpa [#allocation8], 0 }
   0x2   :  { %10 = vsyncpa [#allocation6], 0 }
   0x3   :  { %12 = vsyncpa [#allocation6 + $0x1], 0  ;;  %s892_s12 = smov 0   ;;  %s894_s13 = smov 0  }
   0x4   :  { %s896_s14 = smov 0   ;;  %s898_s15 = smov 0  }
   0x5   :  { %s900_s16 = smov 0   ;;  %s902_s17 = smov 0  }
   0x6 LB: > { %s541_s18 = sadd.s32 4294967295, %s859_s17   ;;  %s542_s19 = sadd.s32 4294967294, %s859_s17   ;;  %s859_s17 = sphi %s902_s17, %s18_s17   ;;  %s855_s16 = sphi %s900_s16, %s1149_s16   ;;  %s851_s15 = sphi %s898_s15, %s1148_s15   ;;  %s847_s14 = sphi %s896_s14, %s1147_s14   ;;  %s843_s13 = sphi %s894_s13, %s1146_s13   ;;  %s839_s12 = sphi %s892_s12, %s1145_s12  }
   0x7   : > { %s30_s20 = sadd.s32 1, %s855_s16  ;;  %s81_s21 = sadd.s32 1, %s847_s14 }
   0x8   : > { %p32_p0 = scmp.ge.s32.totalorder %s30_s20, 2  ;;  %p91_p1 = scmp.ne.s32.totalorder %s847_s14, %s843_s13 }
   0x9   : > { %p92_p2 = scmp.eq.s32.totalorder %s541_s18, 1  ;;  %p97_p3 = scmp.ne.s32.totalorder %s843_s13, %s839_s12 }
   0xa   : > { %s1151_s20 = smov (%p32_p0, %s30_s20), 0  ;;  %p98_p5 = scmp.eq.s32.totalorder %s542_s19, 1 }
   0xb   : > { %p932_p4 = por %p92_p2, %p91_p1  ;;  %s76_s23 = ssub.s32 %s855_s16, %s1151_s20 }
   0xc   : > { %p543_p6 = scmp.ge.s32.totalorder %s859_s17, 1  ;;  %p79_p7 = scmp.eq.s32.totalorder %s76_s23, 0 }
   0xd   : > { %s1136_s22 = scalar_select %p932_p4, 1, 0 }
   0xe   : > { %p939_p8 = por %p98_p5, %p97_p3  ;;  %p105_p9 = scmp.lt.s32.totalorder %s859_s17, 3 }
   0xf   : > { %s945_s25 = scalar_select %p79_p7, %s847_s14, %s81_s21  }
  0x10   : > { %s1137_s24 = scalar_select %p939_p8, 1, 0 }
  0x11   : > { %p947_p10 = pnand %p543_p6, %p105_p9  ;;  %p951_p11 = scmp.eq.s32.totalorder %s541_s18, 0 }
  0x12   : > { %s861_s28 = smov [#allocation4]   ;;  %s862_s4 = smov [#allocation7]  }
  0x13   : > { %s1138_s26 = scalar_select %p947_p10, 1, 0 }
  0x14   : > { %s1139_s27 = scalar_select %p951_p11, 1, 0 }
  0x15   : > { %p617_p12 = pneg %p947_p10  ;;  %s117_s29 = sshll.u32 %s861_s28, 4  ;;  %s118_s29 = int_to_ptr.vmem [resolvable:$true] %s117_s29 }
  0x16   : > { %s130_s5 = sshll.u32 %s862_s4, 4  ;;  %s691_s8 = scalar_lea.hbm %s1129_s1, 256  ;;  %s963_s5 = int_to_ptr.vmem [resolvable:$true] %s130_s5 }
  0x17   : > { %p959_p13 = pnand %p951_p11, %p617_p12  ;;  %p692_p0 = scmp.ne.s32.totalorder %s1129_s1, %s691_s8 }
  0x18   : > { %p698_p5 = scmp.lt.u32.totalorder %s691_s8, %s1129_s1 }
  0x19   : > { %p693_p1 = pneg %p959_p13 }
  0x1b   : > { %p694_p2 = pnand %p693_p1, %p692_p0 }
  0x1d   : > { %p695_p3 = pneg %p694_p2 }
  0x1f   : > { %p700_p6 = pnand %p698_p5, %p695_p3 }
  0x21   : > { %703 = shalt.err (!%p700_p6)
}
  0x22   : > { %s704_s19 = scalar_lea.vmem %s118_s29, 256  ;;  %p712_p8 = scmp.lt.s32.totalorder %s118_s29, %s118_s29 }
  0x23   : > { %p705_p7 = scmp.ne.s32.totalorder %s118_s29, %s704_s19  ;;  %p713_p4 = scmp.lt.s32.totalorder %s704_s19, %s704_s19 }
  0x25   : > { %p707_p9 = pnand %p705_p7, %p693_p1  ;;  %p714_p11 = por %p713_p4, %p712_p8 }
  0x27   : > { %p708_p12 = pneg %p707_p9 }
  0x29   : > { %p715_p10 = pnand %p714_p11, %p708_p12 }
  0x2b   : > { %718 = shalt.err (!%p715_p10)
}
  0x2c   : > { %s863_s21 = smov 128   ;;  %s864_s23 = smov 8  }
  0x2d   : > { %620 = dma.hbm_to_vmem [thread:$0]  (!%p959_p13), %s1129_s1, 256, %s118_s29, [#allocation5], %s863_s21, %s863_s21, %s864_s23  }
  0x2e   : > { %s719_s8 = scalar_lea.hbm %s1130_s2, 1024 }
  0x2f   : > { %p720_p0 = scmp.ne.s32.totalorder %s1130_s2, %s719_s8  ;;  %p726_p10 = scmp.lt.u32.totalorder %s719_s8, %s1130_s2 }
  0x31   : > { %p722_p4 = pnand %p720_p0, %p693_p1 }
  0x33   : > { %p723_p8 = pneg %p722_p4 }
  0x35   : > { %p728_p11 = pnand %p726_p10, %p723_p8 }
  0x37   : > { %731 = shalt.err (!%p728_p11)
}
  0x38   : > { %s732_s29 = scalar_lea.vmem %s963_s5, 1024  ;;  %p740_p6 = scmp.lt.s32.totalorder %s963_s5, %s963_s5 }
  0x39   : > { %p733_p2 = scmp.ne.s32.totalorder %s963_s5, %s732_s29  ;;  %p741_p7 = scmp.lt.s32.totalorder %s732_s29, %s732_s29 }
  0x3b   : > { %p735_p3 = pnand %p733_p2, %p693_p1  ;;  %p742_p9 = por %p741_p7, %p740_p6 }
  0x3d   : > { %p736_p5 = pneg %p735_p3 }
  0x3f   : > { %p743_p12 = pnand %p742_p9, %p736_p5 }
  0x41   : > { %746 = shalt.err (!%p743_p12)
}
  0x42   : > { %623 = dma.hbm_to_vmem [thread:$0]  (!%p959_p13), %s1130_s2, 1024, %s963_s5, [#allocation8], %s863_s21, %s863_s21, %s864_s23  }
  0x43   : > { %p1141_p0 = scmp.ne.s32.totalorder %s1138_s26, 0 }
  0x44   : > { %p1142_p4 = scmp.ne.s32.totalorder (!%p1141_p0), %s1139_s27, 0 }
  0x45   : > { %146 = sbr.rel (%p1141_p0) target bundleno = 591 (0x24f), region = 28 }
  0x4c   : > { %824 = dma.done.wait (%p1142_p4), [#allocation5], 256  }
  0x4d   : > { %826 = vsyncadd (%p1142_p4), [#allocation5], 4294967040 }
  0x4e   : > { %828 = dma.done.wait (%p1142_p4), [#allocation8], 1024  }
  0x4f   : > { %830 = vsyncadd (%p1142_p4), [#allocation8], 4294966272  ;;  %v170_v0 = vlaneseq  ;;  %s164_s30 = sand.u32 1, %s843_s13   ;;  %s560_s5 = smul.u32 288, %s851_s15 }
  0x50   : > { %s1026_s26 = sshll.u32 %s164_s30, 4  ;;  %s865_s27 = smov [#allocation2]  }
  0x51   : > { %v171_v1 = vshrl.u32 %v170_v0, 7  ;;  %s1031_s4 = scalar_lea.hbm %s1128_s0, %s560_s5  ;;  %s226_s6 = sshll.u32 %s865_s27, 4  ;;  %s227_s6 = int_to_ptr.vmem [resolvable:$true] %s226_s6 }
  0x52   : > { %s747_s7 = scalar_lea.hbm %s1031_s4, 288  ;;  %s749_s10 = scalar_lea.hbm %s1128_s0, 640 }
  0x53   : > { %v172_v2 = vsub.s32 0, %v171_v1  ;;  %v176_v3 = vsub.s32 1, %v171_v1  ;;  %v180_v4 = vsub.s32 2, %v171_v1  ;;  %v184_v5 = vsub.s32 3, %v171_v1  ;;  %p748_p13 = scmp.ne.s32.totalorder %s1031_s4, %s747_s7  ;;  %p750_p1 = scmp.lt.u32.totalorder %s1031_s4, %s1128_s0 }
  0x54   : > { %v188_v6 = vsub.s32 4, %v171_v1  ;;  %v192_v7 = vsub.s32 5, %v171_v1  ;;  %v196_v8 = vsub.s32 6, %v171_v1  ;;  %v200_v9 = vsub.s32 7, %v171_v1  ;;  %p751_p8 = scmp.lt.u32.totalorder %s749_s10, %s747_s7  ;;  %p753_p11 = scmp.lt.u32.totalorder %s747_s7, %s1031_s4 }
  0x56   : > { %p752_p10 = por %p751_p8, %p750_p1 }
  0x58   : > { %p754_p2 = por %p753_p11, %p752_p10 }
  0x5a   : > { %p755_p3 = pnand %p754_p2, %p748_p13 }
  0x5c   : > { %758 = shalt.err (!%p755_p3)  }
  0x5d   : > { %s759_s29 = scalar_lea.vmem %s227_s6, 288  ;;  %s763_s19 = scalar_lea.vmem %s227_s6, 384 }
  0x5e   : > { %p760_p5 = scmp.ne.s32.totalorder %s227_s6, %s759_s29  ;;  %p764_p6 = scmp.lt.s32.totalorder %s227_s6, %s227_s6 }
  0x5f   : > { %p765_p7 = scmp.lt.s32.totalorder %s763_s19, %s759_s29 }
  0x61   : > { %p766_p9 = por %p765_p7, %p764_p6 }
  0x63   : > { %p767_p12 = pnand %p766_p9, %p760_p5 }
  0x65   : > { %770 = shalt.err (!%p767_p12)  }
  0x66   : > { %229 = dma.hbm_to_vmem [thread:$0]  %s1031_s4, 288, %s227_s6, [#allocation3]  ;;  %v168_v10 = vld [vmem:[#allocation4] sm:$0xff]  ;;  %v550_v11 = vld [vmem:[#allocation4 + $0x8] ss:$0 sm:$0xff]  ;;  %v206_v12 = vld [vmem:[#allocation7] sm:$0xff] }
  0x67   : > { %v1044_v13 = vrot.slane %v168_v10, %v172_v2  ;;  %v177_v14 = vrot.slane %v168_v10, %v176_v3  ;;  %v181_v15 = vrot.slane %v168_v10, %v180_v4  ;;  %v1046_v16 = vrot.slane %v168_v10, %v184_v5  ;;  %v207_v17 = vld [vmem:[#allocation7 + $0x8] sm:$0xff]  ;;  %v208_v18 = vld [vmem:[#allocation7 + $0x10] sm:$0xff]  ;;  %v209_v19 = vld [vmem:[#allocation7 + $0x18] sm:$0xff]  ;;  %s1051_s28 = scalar_lea.vmem [#allocation9], %s1026_s26 }
  0x68   : > { %v189_v20 = vrot.slane %v168_v10, %v188_v6  ;;  %v193_v21 = vrot.slane %v168_v10, %v192_v7  ;;  %v1048_v22 = vrot.slane %v168_v10, %v196_v8  ;;  %v201_v23 = vrot.slane %v168_v10, %v200_v9  ;;  %v210_v24 = vld [vmem:[#allocation7 + $0x20] sm:$0xff]  ;;  %v211_v25 = vld [vmem:[#allocation7 + $0x28] sm:$0xff]  ;;  %v212_v26 = vld [vmem:[#allocation7 + $0x30] sm:$0xff] }
  0x69   : > { %v213_v27 = vld [vmem:[#allocation7 + $0x38] sm:$0xff] }
  0x6a   : > { %831 = dma.done.wait [#allocation3], 288 }
  0x6b   : > { %832 = vsyncadd [#allocation3], 4294967008  ;;  %s866_s5 = smov 4   ;;  %s867_s21 = smov 8   ;;  %v591_v28 = vpack.c.bf16 %v207_v17, %v206_v12  ;;  %v233_v29 = vld [vmem:[#allocation2] sm:$0xff]  ;;  %v234_v30 = vld [vmem:[#allocation2 + $0x8] sm:$0xff]  ;;  %v595_v31 = vpack.c.bf16 %v209_v19, %v208_v18  ;;  %v599_v36 = vpack.c.bf16 %v211_v25, %v210_v24  ;;  %v603_v42 = vpack.c.bf16 %v213_v27, %v212_v26 }
  0x6c   : > { %240 = vrot.lane.b32.xlu0 %v177_v14, %s866_s5  ;;  %278 = vrot.lane.b32.xlu1 %v189_v20, %s866_s5  ;;  %s868_s26 = smov 124   ;;  %v271_v38 = vld [vmem:[#allocation2 + $0x1] sm:$0xff]  ;;  %v272_v39 = vld [vmem:[#allocation2 + $0x9] sm:$0xff]  ;;  %s869_s23 = smov 120   ;;  %v236_v56 = vmul.f32 %v234_v30, %v1044_v13  ;;  %v235_v57 = vmul.f32 %v233_v29, %v1044_v13  ;;  %vm347_vm0 = vcmask 523264  }
  0x6d   : > { %592 = vmatprep.subr.bf16.mxu0 %v591_v28  ;;  %v309_v49 = vld [vmem:[#allocation2 + $0x2] sm:$0xff]  ;;  %v310_v50 = vld [vmem:[#allocation2 + $0xa] sm:$0xff]  ;;  %v274_v62 = vmul.f32 %v272_v39, %v1046_v16  ;;  %v273_v63 = vmul.f32 %v271_v38, %v1046_v16  ;;  %s561_s4 = sshll.u32 %s851_s15, 8  ;;  %s447_s27 = sshll.u32 %s1051_s28, 4  ;;  %s1075_s27 = int_to_ptr.vmem [resolvable:$true] %s447_s27 }
  0x6e   : > { %594 = vmatpush3.bf16.msra.mxu0 %v591_v28  ;;  %v312_v10 = vmul.f32 %v310_v50, %v1048_v22  ;;  %s1073_s8 = scalar_lea.hbm %s1131_s3, %s561_s4  ;;  %s1081_s9 = scalar_lea.sflag [#allocation6], %s164_s30 }
  0x6f   : > { %596 = vmatprep.subr.bf16.mxu0 %v595_v31  ;;  %s771_s10 = scalar_lea.vmem %s1075_s27, 256  ;;  %p1143_p4 = scmp.ne.s32.totalorder %s1136_s22, 0 }
  0x70   : > { %256 = vrot.lane.b32.xlu0 %v181_v15, %s867_s21  ;;  %294 = vrot.lane.b32.xlu1 %v193_v21, %s867_s21  ;;  %p772_p0 = scmp.ne.s32.totalorder %s1075_s27, %s771_s10  ;;  %s870_s15 = smov [#allocation9]  }
  0x71   : > { %s775_s11 = sshll.u32 %s870_s15, 4  ;;  %s776_s11 = int_to_ptr.vmem [resolvable:$false] %s775_s11 }
  0x72   : > { %598 = vmatpush3.bf16.msra.mxu0 %v595_v31  ;;  %p773_p13 = pnand %p772_p0, %p1143_p4  ;;  %s777_s18 = scalar_lea.vmem %s776_s11, 512 }
  0x73   : > { %600 = vmatprep.subr.bf16.mxu0 %v599_v36  ;;  %p778_p8 = scmp.lt.s32.totalorder %s1075_s27, %s776_s11  ;;  %p779_p10 = scmp.lt.s32.totalorder %s777_s18, %s771_s10 }
  0x74   : > { %316 = vrot.lane.b32.xlu0 %v201_v23, %s866_s5  ;;  %332 = vrot.lane.b32.xlu1 %v550_v11, %s867_s21  ;;  %v311_v11 = vmul.f32 %v309_v49, %v1048_v22  ;;  %p774_p1 = pneg %p773_p13 }
  0x75   : > { %p780_p11 = por %p779_p10, %p778_p8 }
  0x76   : > { %602 = vmatpush3.bf16.msra.mxu0 %v599_v36 }
  0x77   : > { %604 = vmatprep.subr.bf16.mxu0 %v603_v42  ;;  %p781_p2 = pnand %p780_p11, %p774_p1 }
  0x7a   : > { %606 = vmatpush3.bf16.msra.mxu0 %v603_v42 }
  0xde   : > { %v241_v32 = vpop.permute.xlu0 %240  ;;  %v279_v35 = vpop.permute.xlu1 %278 }
  0xdf   : > { %v243_v33 = vmul.f32 %v241_v32, %v233_v29  ;;  %v244_v34 = vmul.f32 %v241_v32, %v234_v30  ;;  %v281_v43 = vmul.f32 %v279_v35, %v271_v38  ;;  %v282_v44 = vmul.f32 %v279_v35, %v272_v39 }
  0xe1   : > { %249 = vrot.lane.b32.xlu1 %v244_v34, %s868_s26  ;;  %247 = vrot.lane.b32.xlu0 %v243_v33, %s868_s26 }
  0xe2   : > { %v257_v37 = vpop.permute.xlu0 %256  ;;  %v295_v45 = vpop.permute.xlu1 %294 }
  0xe3   : > { %v259_v40 = vmul.f32 %v257_v37, %v233_v29  ;;  %v260_v41 = vmul.f32 %v257_v37, %v234_v30  ;;  %v297_v46 = vmul.f32 %v295_v45, %v271_v38  ;;  %v298_v47 = vmul.f32 %v295_v45, %v272_v39 }
  0xe5   : > { %265 = vrot.lane.b32.xlu1 %v260_v41, %s869_s23  ;;  %263 = vrot.lane.b32.xlu0 %v259_v40, %s869_s23 }
  0xe6   : > { %v317_v48 = vpop.permute.xlu0 %316  ;;  %v333_v53 = vpop.permute.xlu1 %332 }
  0xe7   : > { %v319_v51 = vmul.f32 %v317_v48, %v309_v49  ;;  %v320_v52 = vmul.f32 %v317_v48, %v310_v50  ;;  %v335_v54 = vmul.f32 %v333_v53, %v309_v49  ;;  %v336_v55 = vmul.f32 %v333_v53, %v310_v50 }
  0xe9   : > { %287 = vrot.lane.b32.xlu1 %v282_v44, %s868_s26  ;;  %285 = vrot.lane.b32.xlu0 %v281_v43, %s868_s26 }
  0xed   : > { %303 = vrot.lane.b32.xlu1 %v298_v47, %s869_s23  ;;  %301 = vrot.lane.b32.xlu0 %v297_v46, %s869_s23 }
  0xf1   : > { %325 = vrot.lane.b32.xlu1 %v320_v52, %s868_s26  ;;  %323 = vrot.lane.b32.xlu0 %v319_v51, %s868_s26 }
  0xf5   : > { %341 = vrot.lane.b32.xlu1 %v336_v55, %s869_s23  ;;  %339 = vrot.lane.b32.xlu0 %v335_v54, %s869_s23 }
 0x153   : > { %v250_v58 = vpop.permute.xlu1 %249  ;;  %v248_v59 = vpop.permute.xlu0 %247 }
 0x154   : > { %v254_v60 = vadd.f32 %v250_v58, %v236_v56  ;;  %v253_v61 = vadd.f32 %v248_v59, %v235_v57 }
 0x157   : > { %v266_v0 = vpop.permute.xlu1 %265  ;;  %v264_v1 = vpop.permute.xlu0 %263 }
 0x158   : > { %v270_v2 = vadd.f32 %v266_v0, %v254_v60  ;;  %v269_v3 = vadd.f32 %v264_v1, %v253_v61 }
 0x15a   : > { %v276_v4 = vadd.f32 %v274_v62, %v270_v2  ;;  %v275_v5 = vadd.f32 %v273_v63, %v269_v3 }
 0x15b   : > { %v288_v6 = vpop.permute.xlu1 %287  ;;  %v286_v7 = vpop.permute.xlu0 %285 }
 0x15c   : > { %v292_v8 = vadd.f32 %v288_v6, %v276_v4  ;;  %v291_v9 = vadd.f32 %v286_v7, %v275_v5 }
 0x15f   : > { %v304_v12 = vpop.permute.xlu1 %303  ;;  %v302_v13 = vpop.permute.xlu0 %301 }
 0x160   : > { %v308_v14 = vadd.f32 %v304_v12, %v292_v8  ;;  %v307_v15 = vadd.f32 %v302_v13, %v291_v9 }
 0x162   : > { %v314_v16 = vadd.f32 %v312_v10, %v308_v14  ;;  %v313_v17 = vadd.f32 %v311_v11, %v307_v15 }
 0x163   : > { %v326_v18 = vpop.permute.xlu1 %325  ;;  %v324_v19 = vpop.permute.xlu0 %323 }
 0x164   : > { %v330_v20 = vadd.f32 %v326_v18, %v314_v16  ;;  %v329_v21 = vadd.f32 %v324_v19, %v313_v17 }
 0x167   : > { %v342_v23 = vpop.permute.xlu1 %341  ;;  %v340_v24 = vpop.permute.xlu0 %339 }
 0x168   : > { %v346_v22 = vadd.f32 %v342_v23, %v330_v20  ;;  %v345_v25 = vadd.f32 %v340_v24, %v329_v21 }
 0x16a   : > { %588 = vmatprep.mubr.msk.f32.mxu0 %vm347_vm0, %v345_v25 }
 0x16b   : > { %589 = vmatmul.mubr.msk.f32.vlgmr.msra.gmra.mrb[0].mxu0 %vm347_vm0, %v346_v22 }
 0x23e   : > { %v590_v26 = vpop.f32.mrb[0].mxu0 }
 0x23f   : > { %430 = vst [vmem:[%s1051_s28 + $0x8] sm:$0xff] %v590_v26  ;;  %v420_v27 = vpop.f32.mrb[1].mxu0 }
 0x240   : > { %429 = vst [vmem:[%s1051_s28] sm:$0xff] %v420_v27 }
 0x241   : > { %784 = shalt.err (!%p781_p2)
}
 0x242   : > { %s785_s30 = scalar_lea.hbm %s1073_s8, 256  ;;  %s789_s28 = scalar_lea.hbm %s1131_s3, 512 }
 0x243   : > { %p786_p3 = scmp.ne.s32.totalorder %s1073_s8, %s785_s30  ;;  %p790_p7 = scmp.lt.u32.totalorder %s1073_s8, %s1131_s3 }
 0x244   : > { %p791_p9 = scmp.lt.u32.totalorder %s789_s28, %s785_s30  ;;  %p793_p0 = scmp.lt.u32.totalorder %s785_s30, %s1073_s8 }
 0x245   : > { %p787_p5 = pnand %p786_p3, %p1143_p4 }
 0x246   : > { %p792_p12 = por %p791_p9, %p790_p7 }
 0x247   : > { %p788_p6 = pneg %p787_p5 }
 0x248   : > { %p794_p13 = por %p793_p0, %p792_p12 }
 0x24a   : > { %p795_p1 = pnand %p794_p13, %p788_p6 }
 0x24c   : > { %798 = shalt.err (!%p795_p1)
}
 0x24d   : > { %s871_s23 = smov 128  }
 0x24e   : > { %615 = dma.vmem_to_hbm [thread:$0]  (%p1143_p4), %s1075_s27, 256, %s1073_s8, %s1081_s9, %s871_s23, %s871_s23, %s867_s21  }
 0x24f PF: > { %p632_p8 = scmp.ge.s32.totalorder %s859_s17, 2  ;;  %s462_s4 = sand.u32 1, %s839_s12  }
 0x250   : > { %p1144_p10 = scmp.ne.s32.totalorder %s1137_s24, 0  ;;  %s463_s6 = scalar_lea.sflag [#allocation6], %s462_s4 }
 0x252   : > { %p625_p11 = pnand %p632_p8, %p1144_p10 }
 0x254   : > { %834 = dma.done.wait (!%p625_p11), %s463_s6, 256  }
 0x255   : > { %836 = vsyncadd (!%p625_p11), %s463_s6, 4294967040  ;;  %s18_s17 = sadd.s32 1, %s859_s17   ;;  %s1145_s12 = smov %s843_s13 }
 0x256   : > { %p15_p2 = scmp.ge.s32.totalorder %s18_s17, 4   ;;  %s1146_s13 = smov %s847_s14 }
 0x257   : > { %s1147_s14 = smov %s945_s25  ;;  %s1148_s15 = smov %s855_s16 }
 0x258   : > { %s1149_s16 = smov %s1151_s20  ;;  %17 = sbr.rel (!%p15_p2) target bundleno = 6 (0x6), region = 74 }
 0x25f   :  { %468 = vsyncpa [#allocation5], 1 }
 0x260   :  { %470 = vsyncpa [#allocation5 + $0x1], 1 }
 0x261   :  { %471 = vsyncpa [#allocation8], 1 }
 0x262   :  { %472 = vsyncpa [#allocation6], 1 }
 0x263   :  { %474 = vsyncpa [#allocation6 + $0x1], 1 }
 0x264   :  { %475 = vsyncmov [#allocation3] }
 0x267   :  { %s476_s22 = vpop.sfrf %475 }
 0x268   :  { %p559_p4 = scmp.ne.s32.totalorder %s476_s22, 0 }
 0x26a   :  { %480 = shalt.err (%p559_p4)  }

</bundles_post_ra>
